<compile_context>
chip_gen: v7x
topology: tpu7x:2x2x1
jax: 0.10.0
libtpu: 0.0.40
codegen_flags: <defaults>
</compile_context>

<pallas_src>
import math
import functools

import jax
import jax.numpy as jnp
from jax import lax
from jax.experimental import pallas as pl
from jax.experimental.pallas import tpu as pltpu


# ---- hyper-parameters (match the PyTorch module defaults) -------------------
SCALE = 80.0
EMB_SIZE = 32
NUM_CLASS = 10
U_A = 110.0
L_A = 10.0
U_M = 0.8
L_M = 0.4
EASY_MARGIN = True

_NEG_BIG = -1e30  # finite "-inf" for masked / init values (avoids inf-inf NaNs)


def _round_up(x, m):
    return (x + m - 1) // m * m


def _magface_kernel(emb_ref, winv_ref, w_ref, label_ref, out_ref,
                    emb_n_scr, norm_scr, m_scr, l_scr, t_scr, *,
                    scale, u_a, l_a, u_m, l_m, easy_margin,
                    num_cls, tile_c, bf16_matmul):
    j = pl.program_id(1)
    nj = pl.num_programs(1)

    # ---- once per batch tile: normalize embedding rows, reset accumulators ----
    @pl.when(j == 0)
    def _init():
        emb = emb_ref[...].astype(jnp.float32)                       # (TB, E)
        sumsq = jnp.sum(emb * emb, axis=1, keepdims=True)            # (TB, 1)
        inv_norm = lax.rsqrt(jnp.maximum(sumsq, 1e-24))              # 1/max(||e||,1e-12)
        emb_n_scr[...] = emb * inv_norm
        norm_scr[...] = sumsq * inv_norm                             # ||e||
        m_scr[...] = jnp.full_like(m_scr, _NEG_BIG)                  # running max
        l_scr[...] = jnp.zeros_like(l_scr)                           # running sum
        t_scr[...] = jnp.zeros_like(t_scr)                           # target cosine

    # ---- every class tile: cosine sims on the MXU + online log-sum-exp ----
    emb_n = emb_n_scr[...]
    w_tile = w_ref[...]
    if bf16_matmul:
        emb_n = emb_n.astype(jnp.bfloat16)
        w_tile = w_tile.astype(jnp.bfloat16)
    else:
        w_tile = w_tile.astype(jnp.float32)
    sim = lax.dot_general(emb_n, w_tile,
                          dimension_numbers=(((1,), (1,)), ((), ())),
                          preferred_element_type=jnp.float32)        # (TB, TC)
    # fold in the precomputed 1/||w_c|| column scale, then clamp like the ref
    sim = jnp.clip(sim * winv_ref[...], -1.0, 1.0)

    col = jax.lax.broadcasted_iota(jnp.int32, sim.shape, 1) + j * tile_c
    labels = label_ref[...]                                          # (TB, 1) int32
    one_hot = col == labels                                          # (TB, TC) bool

    # capture the target-class cosine; exactly one class tile contributes per row
    t_scr[...] = t_scr[...] + jnp.sum(
        jnp.where(one_hot, sim, 0.0), axis=1, keepdims=True)

    # online LSE over the *unmodified* scaled logits (padded classes masked out)
    logits = jnp.where(col < num_cls, sim * scale, _NEG_BIG)
    m_old = m_scr[...]
    m_new = jnp.maximum(m_old, jnp.max(logits, axis=1, keepdims=True))
    alpha = jnp.exp(m_old - m_new)
    l_scr[...] = alpha * l_scr[...] + jnp.sum(
        jnp.exp(logits - m_new), axis=1, keepdims=True)
    m_scr[...] = m_new

    # ---- last class tile: margin on the target logit only, CE + g_a regularizer ----
    @pl.when(j == nj - 1)
    def _finalize():
        norm_c = jnp.clip(norm_scr[...], l_a, u_a)                   # (TB, 1)
        m_a = (u_m - l_m) / (u_a - l_a) * (norm_c - l_a) + l_m
        cos_t = t_scr[...]                                           # (TB, 1)
        sin_t = jnp.sqrt(jnp.maximum(1.0 - cos_t * cos_t, 0.0))
        cos_tm = cos_t * jnp.cos(m_a) - sin_t * jnp.sin(m_a)
        if easy_margin:
            cos_tm = jnp.where(cos_t > 0.0, cos_tm, cos_t)
        else:
            th = jnp.cos(jnp.float32(math.pi) - m_a)
            sinmm = jnp.sin(jnp.float32(math.pi) - m_a) * m_a
            cos_tm = jnp.where(cos_t > th, cos_tm, cos_t - sinmm)

        t_unmod = cos_t * scale      # target logit currently inside the running sum
        t_mod = cos_tm * scale       # margin-modified target logit
        m_fin = m_scr[...]
        # swap exp(t_unmod) -> exp(t_mod) inside the accumulated sum
        l_corr = l_scr[...] - jnp.exp(t_unmod - m_fin) + jnp.exp(t_mod - m_fin)
        lse = m_fin + jnp.log(l_corr)
        ce = lse - t_mod

        lambda_g = (scale * u_a ** 2 * l_a ** 2 / (u_a ** 2 - l_a ** 2)
                    * (u_m - l_m) / (u_a - l_a))
        g_row = pl.reciprocal(norm_c) + norm_c * (1.0 / (u_a * u_a))
        # per-row loss; batch mean of this equals mean(CE) + lambda_g * mean(g)
        out_ref[...] = ce + lambda_g * g_row


def magface_forward(embedding, weight_matrix, labels, *, scale=SCALE,
                    u_a=U_A, l_a=L_A, u_m=U_M, l_m=L_M,
                    easy_margin=EASY_MARGIN, tile_b=None, tile_c=None,
                    bf16_matmul=False):
    B, E = embedding.shape
    C, E2 = weight_matrix.shape
    assert E == E2

    # ---- lane/sublane-aligned padding & tiling --------------------------------
    E_pad = _round_up(E, 128)
    if tile_b is None:
        tile_b = min(_round_up(B, 8), 256)
    tile_b = _round_up(tile_b, 8)
    if tile_c is None:
        # 128-aligned class tile, small enough to double-buffer comfortably
        # inside v7x's 64 MiB VMEM even for large embedding sizes.
        tile_c = min(_round_up(C, 128), 512)
    tile_c = _round_up(tile_c, 128)
    B_pad = _round_up(B, tile_b)
    C_pad = _round_up(C, tile_c)

    emb_p = jnp.zeros((B_pad, E_pad), jnp.float32).at[:B, :E].set(
        embedding.astype(jnp.float32))
    w_p = jnp.zeros((C_pad, E_pad), jnp.float32).at[:C, :E].set(
        weight_matrix.astype(jnp.float32))
    # precompute 1/||w_c|| once (single cheap XLA op) so weight tiles are not
    # re-normalized inside the kernel for every batch tile.
    w_inv = (1.0 / jnp.maximum(
        jnp.sqrt(jnp.sum(w_p * w_p, axis=1, keepdims=True)), 1e-12)).reshape(1, C_pad)
    lab_p = jnp.zeros((B_pad, 1), jnp.int32).at[:B, 0].set(labels.astype(jnp.int32))

    nb = B_pad // tile_b
    nc = C_pad // tile_c

    kernel = functools.partial(
        _magface_kernel, scale=float(scale), u_a=float(u_a), l_a=float(l_a),
        u_m=float(u_m), l_m=float(l_m), easy_margin=easy_margin,
        num_cls=C, tile_c=tile_c, bf16_matmul=bf16_matmul)

    # double-buffered tiles + scratch, clamped with headroom under 64 MiB (v7x)
    tile_bytes = 4 * (tile_c * E_pad + tile_b * E_pad + tile_c + 2 * tile_b)
    scratch_bytes = 4 * (tile_b * E_pad + 4 * tile_b)
    vmem_limit = int(min(56 << 20, max(32 << 20, 4 * tile_bytes + scratch_bytes)))

    per_row = pl.pallas_call(
        kernel,
        out_shape=jax.ShapeDtypeStruct((B_pad, 1), jnp.float32),
        grid_spec=pltpu.PrefetchScalarGridSpec(
            num_scalar_prefetch=0,
            grid=(nb, nc),
            in_specs=[
                pl.BlockSpec((tile_b, E_pad), lambda i, j: (i, 0)),   # embedding
                pl.BlockSpec((1, tile_c), lambda i, j: (0, j)),       # 1/||w||
                pl.BlockSpec((tile_c, E_pad), lambda i, j: (j, 0)),   # weights
                pl.BlockSpec((tile_b, 1), lambda i, j: (i, 0)),       # labels
            ],
            out_specs=pl.BlockSpec((tile_b, 1), lambda i, j: (i, 0)),
            scratch_shapes=[
                pltpu.VMEM((tile_b, E_pad), jnp.float32),   # normalized embedding
                pltpu.VMEM((tile_b, 1), jnp.float32),       # ||embedding||
                pltpu.VMEM((tile_b, 1), jnp.float32),       # running max
                pltpu.VMEM((tile_b, 1), jnp.float32),       # running sum
                pltpu.VMEM((tile_b, 1), jnp.float32),       # target-class cosine
            ]),
        compiler_params=pltpu.CompilerParams(
            dimension_semantics=("parallel", "arbitrary"),
            vmem_limit_bytes=vmem_limit),
    )(emb_p, w_inv, w_p, lab_p)

    # per-row loss already includes lambda_g * g_row; final scalar is the mean
    # over the real (unpadded) batch rows.
    return jnp.mean(per_row[:B, 0])


def magface_reference(embedding, weight_matrix, labels, *, scale=SCALE,
                      u_a=U_A, l_a=L_A, u_m=U_M, l_m=L_M,
                      easy_margin=EASY_MARGIN):
    """Pure-JAX reference mirroring the PyTorch forward()."""
    emb = embedding.astype(jnp.float32)
    w = weight_matrix.astype(jnp.float32)
    emb_norm = jnp.linalg.norm(emb, axis=1, keepdims=True)
    emb_n = emb / jnp.maximum(emb_norm, 1e-12)
    w_n = w / jnp.maximum(jnp.linalg.norm(w, axis=1, keepdims=True), 1e-12)
    sim = jnp.clip(emb_n @ w_n.T, -1.0, 1.0)
    norm_c = jnp.clip(emb_norm, l_a, u_a)
    m_a = (u_m - l_m) / (u_a - l_a) * (norm_c - l_a) + l_m
    g_a = jnp.mean(1.0 / norm_c + norm_c / u_a ** 2)
    cos = sim
    sin = jnp.sqrt(1.0 - cos ** 2)
    cos_m = cos * jnp.cos(m_a) - sin * jnp.sin(m_a)
    if easy_margin:
        cos_m = jnp.where(cos > 0, cos_m, cos)
    else:
        th = jnp.cos(math.pi - m_a)
        sinmm = jnp.sin(math.pi - m_a) * m_a
        cos_m = jnp.where(cos > th, cos_m, cos - sinmm)
    cos_s, cos_m_s = cos * scale, cos_m * scale
    one_hot = jax.nn.one_hot(labels, sim.shape[1], dtype=jnp.float32)
    logits = one_hot * cos_m_s + (1.0 - one_hot) * cos_s
    ce = jnp.mean(-jax.nn.log_softmax(logits, axis=1)[
        jnp.arange(logits.shape[0]), labels])
    lambda_g = (scale * u_a ** 2 * l_a ** 2 / (u_a ** 2 - l_a ** 2)
                * (u_m - l_m) / (u_a - l_a))
    return ce + lambda_g * g_a


if __name__ == "__main__":
    key = jax.random.PRNGKey(0)
    k_emb, k_w, k_lab, k_mag = jax.random.split(key, 4)

    # ---- case 1: module defaults (B=8, emb_size=32, num_class=10) ----
    B = 8
    xavier_std = math.sqrt(2.0 / (NUM_CLASS + EMB_SIZE))
    weight_matrix = (jax.random.normal(k_w, (NUM_CLASS, EMB_SIZE),
                                       dtype=jnp.float32) * xavier_std)
    emb_dir = jax.random.normal(k_emb, (B, EMB_SIZE), dtype=jnp.float32)
    mags = jax.random.uniform(k_mag, (B, 1), minval=5.0, maxval=40.0)
    embedding = emb_dir * mags
    labels = jax.random.randint(k_lab, (B,), 0, NUM_CLASS, dtype=jnp.int32)

    out = jax.block_until_ready(magface_forward(embedding, weight_matrix, labels))
    ref = jax.block_until_ready(magface_reference(embedding, weight_matrix, labels))
    assert jnp.allclose(out, ref, rtol=1e-3, atol=1e-3), (out, ref)

    # ---- case 2: multi-tile grid (3 batch tiles x 3 class tiles, padded dims) ----
    k2 = jax.random.split(jax.random.PRNGKey(1), 4)
    B2, E2, C2 = 24, 96, 300
    w2 = jax.random.normal(k2[0], (C2, E2), jnp.float32) * math.sqrt(2.0 / (C2 + E2))
    emb2 = (jax.random.normal(k2[1], (B2, E2), jnp.float32)
            * jax.random.uniform(k2[2], (B2, 1), minval=5.0, maxval=120.0))
    lab2 = jax.random.randint(k2[3], (B2,), 0, C2, dtype=jnp.int32)
    out2 = jax.block_until_ready(
        magface_forward(emb2, w2, lab2, tile_b=8, tile_c=128))
    ref2 = jax.block_until_ready(magface_reference(emb2, w2, lab2))
    assert jnp.allclose(out2, ref2, rtol=1e-3, atol=1e-3), (out2, ref2)

    # ---- case 3: bf16 MXU inputs with f32 accumulation (looser tolerance) ----
    out_bf16 = jax.block_until_ready(
        magface_forward(embedding, weight_matrix, labels, bf16_matmul=True))
    assert jnp.allclose(out_bf16, ref, rtol=5e-2, atol=5e-1), (out_bf16, ref)

    print("KERNEL_OK")
</pallas_src>

<mosaic_0001>
module attributes {stable_mosaic.version = 11 : i64} {
  func.func @_magface_kernel(%arg0: i32, %arg1: i32, %arg2: memref<8x128xf32, #tpu.memory_space<vmem>>, %arg3: memref<1x128xf32, #tpu.memory_space<vmem>>, %arg4: memref<128x128xf32, #tpu.memory_space<vmem>>, %arg5: memref<8x1xi32, #tpu.memory_space<vmem>>, %arg6: memref<8x1xf32, #tpu.memory_space<vmem>>, %arg7: memref<8x128xf32, #tpu.memory_space<vmem>>, %arg8: memref<8x1xf32, #tpu.memory_space<vmem>>, %arg9: memref<8x1xf32, #tpu.memory_space<vmem>>, %arg10: memref<8x1xf32, #tpu.memory_space<vmem>>, %arg11: memref<8x1xf32, #tpu.memory_space<vmem>>) attributes {dimension_semantics = [#tpu.dimension_semantics<parallel>, #tpu.dimension_semantics<arbitrary>], iteration_bounds = array<i64: 1, 1>, scalar_prefetch = 0 : i64, scratch_operands = 5 : i64, tpu.core_type = #tpu.core_type<tc>, window_params = [{transform_indices = @transform_0, window_bounds = array<i64: 8, 128>}, {transform_indices = @transform_1, window_bounds = array<i64: 1, 128>}, {transform_indices = @transform_2, window_bounds = array<i64: 128, 128>}, {transform_indices = @transform_3, window_bounds = array<i64: 8, 1>}, {transform_indices = @transform_4, window_bounds = array<i64: 8, 1>}]} {
    %c0_i32 = arith.constant 0 : i32
    %0 = arith.cmpi eq, %arg1, %c0_i32 : i32
    %1 = arith.extui %0 : i1 to i32
    %c0_i32_0 = arith.constant 0 : i32
    %2 = arith.cmpi ne, %1, %c0_i32_0 : i32
    scf.if %2 {
      %c0_30 = arith.constant 0 : index
      %c0_31 = arith.constant 0 : index
      %52 = vector.load %arg2[%c0_30, %c0_31] : memref<8x128xf32, #tpu.memory_space<vmem>>, vector<8x128xf32>
      %53 = arith.mulf %52, %52 : vector<8x128xf32>
      %cst_32 = arith.constant dense<0.000000e+00> : vector<8xf32>
      %54 = vector.multi_reduction <add>, %53, %cst_32 [1] : vector<8x128xf32> to vector<8xf32>
      %55 = vector.shape_cast %54 : vector<8xf32> to vector<8x1xf32>
      %cst_33 = arith.constant 1.000000e-24 : f32
      %56 = vector.broadcast %cst_33 : f32 to vector<8x1xf32>
      %57 = arith.maximumf %55, %56 : vector<8x1xf32>
      %58 = math.rsqrt %57 : vector<8x1xf32>
      %59 = vector.broadcast %58 : vector<8x1xf32> to vector<8x128xf32>
      %60 = arith.mulf %52, %59 : vector<8x128xf32>
      %c0_34 = arith.constant 0 : index
      %c0_35 = arith.constant 0 : index
      %61 = vector.load %arg7[%c0_34, %c0_35] : memref<8x128xf32, #tpu.memory_space<vmem>>, vector<8x128xf32>
      tpu.vector_store %arg7[%c0_34, %c0_35], %60 {strides = array<i32>} : memref<8x128xf32, #tpu.memory_space<vmem>>, vector<8x128xf32>,
      %62 = arith.mulf %55, %58 : vector<8x1xf32>
      %c0_36 = arith.constant 0 : index
      %c0_37 = arith.constant 0 : index
      %63 = vector.load %arg8[%c0_36, %c0_37] : memref<8x1xf32, #tpu.memory_space<vmem>>, vector<8x1xf32>
      tpu.vector_store %arg8[%c0_36, %c0_37], %62 {strides = array<i32>} : memref<8x1xf32, #tpu.memory_space<vmem>>, vector<8x1xf32>,
      %cst_38 = arith.constant -1.000000e+30 : f32
      %64 = vector.broadcast %cst_38 : f32 to vector<8x1xf32>
      %c0_39 = arith.constant 0 : index
      %c0_40 = arith.constant 0 : index
      %65 = vector.load %arg9[%c0_39, %c0_40] : memref<8x1xf32, #tpu.memory_space<vmem>>, vector<8x1xf32>
      tpu.vector_store %arg9[%c0_39, %c0_40], %64 {strides = array<i32>} : memref<8x1xf32, #tpu.memory_space<vmem>>, vector<8x1xf32>,
      %cst_41 = arith.constant 0.000000e+00 : f32
      %66 = vector.broadcast %cst_41 : f32 to vector<8x1xf32>
      %c0_42 = arith.constant 0 : index
      %c0_43 = arith.constant 0 : index
      %67 = vector.load %arg10[%c0_42, %c0_43] : memref<8x1xf32, #tpu.memory_space<vmem>>, vector<8x1xf32>
      tpu.vector_store %arg10[%c0_42, %c0_43], %66 {strides = array<i32>} : memref<8x1xf32, #tpu.memory_space<vmem>>, vector<8x1xf32>,
      %cst_44 = arith.constant 0.000000e+00 : f32
      %68 = vector.broadcast %cst_44 : f32 to vector<8x1xf32>
      %c0_45 = arith.constant 0 : index
      %c0_46 = arith.constant 0 : index
      %69 = vector.load %arg11[%c0_45, %c0_46] : memref<8x1xf32, #tpu.memory_space<vmem>>, vector<8x1xf32>
      tpu.vector_store %arg11[%c0_45, %c0_46], %68 {strides = array<i32>} : memref<8x1xf32, #tpu.memory_space<vmem>>, vector<8x1xf32>,
    } else {
    }
    %c0 = arith.constant 0 : index
    %c0_1 = arith.constant 0 : index
    %3 = vector.load %arg7[%c0, %c0_1] : memref<8x128xf32, #tpu.memory_space<vmem>>, vector<8x128xf32>
    %c0_2 = arith.constant 0 : index
    %c0_3 = arith.constant 0 : index
    %4 = vector.load %arg4[%c0_2, %c0_3] : memref<128x128xf32, #tpu.memory_space<vmem>>, vector<128x128xf32>
    %cst = arith.constant dense<0.000000e+00> : vector<8x128xf32>
    %5 = tpu.matmul %3, %4, %cst {dimension_numbers = #tpu.dot_dimension_numbers<[1], [1], [0], [0], [0, 0, 1, 0], [], []>} : vector<8x128xf32>, vector<128x128xf32>, vector<8x128xf32> -> vector<8x128xf32>
    %c0_4 = arith.constant 0 : index
    %c0_5 = arith.constant 0 : index
    %6 = vector.load %arg3[%c0_4, %c0_5] : memref<1x128xf32, #tpu.memory_space<vmem>>, vector<1x128xf32>
    %7 = vector.broadcast %6 : vector<1x128xf32> to vector<8x128xf32>
    %8 = arith.mulf %5, %7 : vector<8x128xf32>
    %cst_6 = arith.constant -1.000000e+00 : f32
    %cst_7 = arith.constant 1.000000e+00 : f32
    %9 = vector.broadcast %cst_6 : f32 to vector<8x128xf32>
    %10 = arith.maximumf %9, %8 : vector<8x128xf32>
    %11 = vector.broadcast %cst_7 : f32 to vector<8x128xf32>
    %12 = arith.minimumf %11, %10 : vector<8x128xf32>
    %13 = tpu.iota {dimensions = array<i32: 1>} : vector<8x128xi32>
    %c128_i32 = arith.constant 128 : i32
    %14 = arith.muli %arg1, %c128_i32 : i32
    %15 = vector.broadcast %14 : i32 to vector<8x128xi32>
    %16 = arith.addi %13, %15 : vector<8x128xi32>
    %c0_8 = arith.constant 0 : index
    %c0_9 = arith.constant 0 : index
    %17 = vector.load %arg5[%c0_8, %c0_9] : memref<8x1xi32, #tpu.memory_space<vmem>>, vector<8x1xi32>
    %18 = vector.broadcast %17 : vector<8x1xi32> to vector<8x128xi32>
    %19 = arith.cmpi eq, %16, %18 : vector<8x128xi32>
    %c0_10 = arith.constant 0 : index
    %c0_11 = arith.constant 0 : index
    %20 = vector.load %arg11[%c0_10, %c0_11] : memref<8x1xf32, #tpu.memory_space<vmem>>, vector<8x1xf32>
    %cst_12 = arith.constant 0.000000e+00 : f32
    %21 = vector.broadcast %cst_12 : f32 to vector<8x128xf32>
    %22 = arith.select %19, %12, %21 : vector<8x128xi1>, vector<8x128xf32>
    %cst_13 = arith.constant dense<0.000000e+00> : vector<8xf32>
    %23 = vector.multi_reduction <add>, %22, %cst_13 [1] : vector<8x128xf32> to vector<8xf32>
    %24 = vector.shape_cast %23 : vector<8xf32> to vector<8x1xf32>
    %25 = arith.addf %20, %24 : vector<8x1xf32>
    %c0_14 = arith.constant 0 : index
    %c0_15 = arith.constant 0 : index
    %26 = vector.load %arg11[%c0_14, %c0_15] : memref<8x1xf32, #tpu.memory_space<vmem>>, vector<8x1xf32>
    tpu.vector_store %arg11[%c0_14, %c0_15], %25 {strides = array<i32>} : memref<8x1xf32, #tpu.memory_space<vmem>>, vector<8x1xf32>,
    %c10_i32 = arith.constant 10 : i32
    %27 = vector.broadcast %c10_i32 : i32 to vector<8x128xi32>
    %28 = arith.cmpi slt, %16, %27 : vector<8x128xi32>
    %cst_16 = arith.constant 8.000000e+01 : f32
    %29 = vector.broadcast %cst_16 : f32 to vector<8x128xf32>
    %30 = arith.mulf %12, %29 : vector<8x128xf32>
    %cst_17 = arith.constant -1.000000e+30 : f32
    %31 = vector.broadcast %cst_17 : f32 to vector<8x128xf32>
    %32 = arith.select %28, %30, %31 : vector<8x128xi1>, vector<8x128xf32>
    %c0_18 = arith.constant 0 : index
    %c0_19 = arith.constant 0 : index
    %33 = vector.load %arg9[%c0_18, %c0_19] : memref<8x1xf32, #tpu.memory_space<vmem>>, vector<8x1xf32>
    %cst_20 = arith.constant dense<0xFF800000> : vector<8xf32>
    %34 = vector.multi_reduction <maximumf>, %32, %cst_20 [1] : vector<8x128xf32> to vector<8xf32>
    %35 = vector.shape_cast %34 : vector<8xf32> to vector<8x1xf32>
    %36 = arith.maximumf %33, %35 : vector<8x1xf32>
    %37 = arith.subf %33, %36 : vector<8x1xf32>
    %38 = math.exp %37 : vector<8x1xf32>
    %c0_21 = arith.constant 0 : index
    %c0_22 = arith.constant 0 : index
    %39 = vector.load %arg10[%c0_21, %c0_22] : memref<8x1xf32, #tpu.memory_space<vmem>>, vector<8x1xf32>
    %40 = arith.mulf %38, %39 : vector<8x1xf32>
    %41 = vector.broadcast %36 : vector<8x1xf32> to vector<8x128xf32>
    %42 = arith.subf %32, %41 : vector<8x128xf32>
    %43 = math.exp %42 : vector<8x128xf32>
    %cst_23 = arith.constant dense<0.000000e+00> : vector<8xf32>
    %44 = vector.multi_reduction <add>, %43, %cst_23 [1] : vector<8x128xf32> to vector<8xf32>
    %45 = vector.shape_cast %44 : vector<8xf32> to vector<8x1xf32>
    %46 = arith.addf %40, %45 : vector<8x1xf32>
    %c0_24 = arith.constant 0 : index
    %c0_25 = arith.constant 0 : index
    %47 = vector.load %arg10[%c0_24, %c0_25] : memref<8x1xf32, #tpu.memory_space<vmem>>, vector<8x1xf32>
    tpu.vector_store %arg10[%c0_24, %c0_25], %46 {strides = array<i32>} : memref<8x1xf32, #tpu.memory_space<vmem>>, vector<8x1xf32>,
    %c0_26 = arith.constant 0 : index
    %c0_27 = arith.constant 0 : index
    %48 = vector.load %arg9[%c0_26, %c0_27] : memref<8x1xf32, #tpu.memory_space<vmem>>, vector<8x1xf32>
    tpu.vector_store %arg9[%c0_26, %c0_27], %36 {strides = array<i32>} : memref<8x1xf32, #tpu.memory_space<vmem>>, vector<8x1xf32>,
    %c0_i32_28 = arith.constant 0 : i32
    %49 = arith.cmpi eq, %arg1, %c0_i32_28 : i32
    %50 = arith.extui %49 : i1 to i32
    %c0_i32_29 = arith.constant 0 : i32
    %51 = arith.cmpi ne, %50, %c0_i32_29 : i32
    scf.if %51 {
      %c0_30 = arith.constant 0 : index
      %c0_31 = arith.constant 0 : index
      %52 = vector.load %arg8[%c0_30, %c0_31] : memref<8x1xf32, #tpu.memory_space<vmem>>, vector<8x1xf32>
      %cst_32 = arith.constant 1.000000e+01 : f32
      %cst_33 = arith.constant 1.100000e+02 : f32
      %53 = vector.broadcast %cst_32 : f32 to vector<8x1xf32>
      %54 = arith.maximumf %53, %52 : vector<8x1xf32>
      %55 = vector.broadcast %cst_33 : f32 to vector<8x1xf32>
      %56 = arith.minimumf %55, %54 : vector<8x1xf32>
      %cst_34 = arith.constant 1.000000e+01 : f32
      %57 = vector.broadcast %cst_34 : f32 to vector<8x1xf32>
      %58 = arith.subf %56, %57 : vector<8x1xf32>
      %cst_35 = arith.constant 4.000000e-03 : f32
      %59 = vector.broadcast %cst_35 : f32 to vector<8x1xf32>
      %60 = arith.mulf %59, %58 : vector<8x1xf32>
      %cst_36 = arith.constant 4.000000e-01 : f32
      %61 = vector.broadcast %cst_36 : f32 to vector<8x1xf32>
      %62 = arith.addf %60, %61 : vector<8x1xf32>
      %c0_37 = arith.constant 0 : index
      %c0_38 = arith.constant 0 : index
      %63 = vector.load %arg11[%c0_37, %c0_38] : memref<8x1xf32, #tpu.memory_space<vmem>>, vector<8x1xf32>
      %64 = arith.mulf %63, %63 : vector<8x1xf32>
      %cst_39 = arith.constant 1.000000e+00 : f32
      %65 = vector.broadcast %cst_39 : f32 to vector<8x1xf32>
      %66 = arith.subf %65, %64 : vector<8x1xf32>
      %cst_40 = arith.constant 0.000000e+00 : f32
      %67 = vector.broadcast %cst_40 : f32 to vector<8x1xf32>
      %68 = arith.maximumf %66, %67 : vector<8x1xf32>
      %69 = math.sqrt %68 : vector<8x1xf32>
      %70 = math.cos %62 : vector<8x1xf32>
      %71 = arith.mulf %63, %70 : vector<8x1xf32>
      %72 = math.sin %62 : vector<8x1xf32>
      %73 = arith.mulf %69, %72 : vector<8x1xf32>
      %74 = arith.subf %71, %73 : vector<8x1xf32>
      %cst_41 = arith.constant 0.000000e+00 : f32
      %75 = vector.broadcast %cst_41 : f32 to vector<8x1xf32>
      %76 = arith.cmpf ogt, %63, %75 : vector<8x1xf32>
      %77 = arith.select %76, %74, %63 : vector<8x1xi1>, vector<8x1xf32>
      %cst_42 = arith.constant 8.000000e+01 : f32
      %78 = vector.broadcast %cst_42 : f32 to vector<8x1xf32>
      %79 = arith.mulf %63, %78 : vector<8x1xf32>
      %cst_43 = arith.constant 8.000000e+01 : f32
      %80 = vector.broadcast %cst_43 : f32 to vector<8x1xf32>
      %81 = arith.mulf %77, %80 : vector<8x1xf32>
      %c0_44 = arith.constant 0 : index
      %c0_45 = arith.constant 0 : index
      %82 = vector.load %arg9[%c0_44, %c0_45] : memref<8x1xf32, #tpu.memory_space<vmem>>, vector<8x1xf32>
      %c0_46 = arith.constant 0 : index
      %c0_47 = arith.constant 0 : index
      %83 = vector.load %arg10[%c0_46, %c0_47] : memref<8x1xf32, #tpu.memory_space<vmem>>, vector<8x1xf32>
      %84 = arith.subf %79, %82 : vector<8x1xf32>
      %85 = math.exp %84 : vector<8x1xf32>
      %86 = arith.subf %83, %85 : vector<8x1xf32>
      %87 = arith.subf %81, %82 : vector<8x1xf32>
      %88 = math.exp %87 : vector<8x1xf32>
      %89 = arith.addf %86, %88 : vector<8x1xf32>
      %90 = math.log %89 : vector<8x1xf32>
      %91 = arith.addf %82, %90 : vector<8x1xf32>
      %92 = arith.subf %91, %81 : vector<8x1xf32>
      %93 = tpu.reciprocal %56 : vector<8x1xf32> -> vector<8x1xf32>
      %cst_48 = arith.constant 8.26446266E-5 : f32
      %94 = vector.broadcast %cst_48 : f32 to vector<8x1xf32>
      %95 = arith.mulf %56, %94 : vector<8x1xf32>
      %96 = arith.addf %93, %95 : vector<8x1xf32>
      %cst_49 = arith.constant 32.2666664 : f32
      %97 = vector.broadcast %cst_49 : f32 to vector<8x1xf32>
      %98 = arith.mulf %97, %96 : vector<8x1xf32>
      %99 = arith.addf %92, %98 : vector<8x1xf32>
      %c0_50 = arith.constant 0 : index
      %c0_51 = arith.constant 0 : index
      %100 = vector.load %arg6[%c0_50, %c0_51] : memref<8x1xf32, #tpu.memory_space<vmem>>, vector<8x1xf32>
      tpu.vector_store %arg6[%c0_50, %c0_51], %99 {strides = array<i32>} : memref<8x1xf32, #tpu.memory_space<vmem>>, vector<8x1xf32>,
    } else {
    }
    return
  }
  func.func @transform_0(%arg0: i32, %arg1: i32) -> (i32, i32) {
    %c0_i32 = arith.constant 0 : i32
    %c0_i32_0 = arith.constant 0 : i32
    return %arg0, %c0_i32 : i32, i32
  }
  func.func @transform_1(%arg0: i32, %arg1: i32) -> (i32, i32) {
    %c0_i32 = arith.constant 0 : i32
    %c0_i32_0 = arith.constant 0 : i32
    return %c0_i32, %arg1 : i32, i32
  }
  func.func @transform_2(%arg0: i32, %arg1: i32) -> (i32, i32) {
    %c0_i32 = arith.constant 0 : i32
    %c0_i32_0 = arith.constant 0 : i32
    return %arg1, %c0_i32 : i32, i32
  }
  func.func @transform_3(%arg0: i32, %arg1: i32) -> (i32, i32) {
    %c0_i32 = arith.constant 0 : i32
    %c0_i32_0 = arith.constant 0 : i32
    return %arg0, %c0_i32 : i32, i32
  }
  func.func @transform_4(%arg0: i32, %arg1: i32) -> (i32, i32) {
    %c0_i32 = arith.constant 0 : i32
    %c0_i32_0 = arith.constant 0 : i32
    return %arg0, %c0_i32 : i32, i32
  }
}

</mosaic_0001>

<bundles_post_ra>
// kernel: tpu_custom_call.1
= control target key start
LH: loop header
LB: loop body
LE: loop exit
PB: predicated region body
PF: predicated region fallthrough
CT: control target
= control target key end

     0   :  { %9 = vsyncpa [#allocation8], 0  ;;  %s598_s15 = smov [#allocation7]   ;;  %s716_s0 = inlined_call_operand.vmem [shape: f32[8,128], index: 0, kind: input, shape index: {}]   ;;  %s717_s1 = inlined_call_operand.vmem [shape: f32[1,128], index: 1, kind: input, shape index: {}]   ;;  %s718_s2 = inlined_call_operand.hbm [shape: f32[128,128], index: 2, kind: input, shape index: {}]   ;;  %s719_s3 = inlined_call_operand.vmem [shape: s32[8,1], index: 3, kind: input, shape index: {}]   ;;  %s720_s4 = inlined_call_operand.vmem [shape: f32[8,1], index: 4, kind: output, shape index: {}]  }
   0x1   :  { %s19_s16 = sshll.u32 %s598_s15, 4  ;;  %s574_s19 = scalar_lea.hbm %s718_s2, 2048  ;;  %s20_s16 = int_to_ptr.vmem [resolvable:$true] %s19_s16 }
   0x2   :  { %p575_p0 = scmp.ne.s32.totalorder %s718_s2, %s574_s19  ;;  %p578_p1 = scmp.lt.u32.totalorder %s574_s19, %s718_s2 }
   0x4   :  { %p580_p2 = pnand %p578_p1, %p575_p0 }
   0x6   :  { %583 = shalt.err (!%p580_p2)
}
   0x7   :  { %s584_s24 = scalar_lea.vmem %s20_s16, 2048  ;;  %p589_p4 = scmp.lt.s32.totalorder %s20_s16, %s20_s16 }
   0x8   :  { %p585_p3 = scmp.ne.s32.totalorder %s20_s16, %s584_s24  ;;  %p590_p5 = scmp.lt.s32.totalorder %s584_s24, %s584_s24 }
   0xa   :  { %p591_p6 = por %p590_p5, %p589_p4 }
   0xc   :  { %p592_p7 = pnand %p591_p6, %p585_p3 }
   0xe   :  { %595 = shalt.err (!%p592_p7)
}
   0xf   :  { %s599_s25 = smov 128   ;;  %s600_s26 = smov 8  }
  0x10   :  { %25 = dma.hbm_to_vmem [thread:$0]  %s718_s2, 2048, %s20_s16, [#allocation8], %s599_s25, %s599_s25, %s600_s26  }
  0x11   :  { %596 = dma.done.wait [#allocation8], 2048  }
  0x12   :  { %597 = vsyncadd [#allocation8], 4294965248  ;;  %v601_v0 = vmov 0.0|0.0   ;;  %v35_v1 = vld [vmem:[%s716_s0] sm:$0xff]  ;;  %v51_v3 = vld [vmem:[#allocation7 + $0x8] sm:$0xff]  ;;  %vm44_vm0 = vcmask 7168   ;;  %v146_v37 = vlaneseq }
  0x13   :  { %510 = vmatprep.subr.bf16.mxu0 %v601_v0  ;;  %v50_v2 = vld [vmem:[#allocation7] sm:$0xff]  ;;  %v36_v4 = vmul.f32 %v35_v1, %v35_v1  ;;  %v52_v6 = vld [vmem:[#allocation7 + $0x10] sm:$0xff]  ;;  %v53_v7 = vld [vmem:[#allocation7 + $0x18] sm:$0xff]  ;;  %v602_v18 = vmov 0.0   ;;  %vm603_vm1 = vmmov 0   ;;  %v604_v29 = vmov 0  }
  0x14   :  { %v511_v5 = vpack.c.bf16 %v51_v3, %v50_v2  ;;  %v514_v8 = vpack.c.bf16 %v53_v7, %v52_v6  ;;  %v54_v9 = vld [vmem:[#allocation7 + $0x20] sm:$0xff]  ;;  %v55_v10 = vld [vmem:[#allocation7 + $0x28] sm:$0xff]  ;;  %v56_v12 = vld [vmem:[#allocation7 + $0x30] sm:$0xff]  ;;  %47 = vst.msk [vmem:[#allocation5] sm:$0xff] %vm44_vm0, %v602_v18  ;;  %507 = vmatprep.mubr.msk.f32.mxu0 %vm603_vm1, %v602_v18  ;;  %552 = vset.pattern.permute.xlu1 %v604_v29  ;;  %v605_v35 = vmov -1e+30  }
  0x15   :  { %37 = vadd.xlane.f32.xlu0 %v36_v4  ;;  %v517_v11 = vpack.c.bf16 %v55_v10, %v54_v9  ;;  %v57_v13 = vld [vmem:[#allocation7 + $0x38] sm:$0xff]  ;;  %v58_v15 = vld [vmem:[#allocation7 + $0x40] sm:$0xff]  ;;  %v59_v16 = vld [vmem:[#allocation7 + $0x48] sm:$0xff]  ;;  %48 = vst.msk [vmem:[#allocation6] sm:$0xff] %vm44_vm0, %v602_v18  ;;  %v147_v41 = vand.u32 127, %v146_v37 }
  0x16   :  { %512 = vmatpush3.bf16.xpose.msra.mxu0 %v511_v5  ;;  %v520_v14 = vpack.c.bf16 %v57_v13, %v56_v12  ;;  %v523_v17 = vpack.c.bf16 %v59_v16, %v58_v15  ;;  %v60_v19 = vld [vmem:[#allocation7 + $0x50] sm:$0xff]  ;;  %v61_v20 = vld [vmem:[#allocation7 + $0x58] sm:$0xff]  ;;  %v62_v22 = vld [vmem:[#allocation7 + $0x60] sm:$0xff]  ;;  %553 = vset.pattern.permute.xlu0 %v604_v29  ;;  %46 = vst.msk [vmem:[#allocation4] sm:$0xff] %vm44_vm0, %v605_v35  ;;  %v606_v5 = vmov 920167782  }
  0x17   :  { %513 = vmatprep.subr.bf16.mxu0 %v601_v0  ;;  %v526_v21 = vpack.c.bf16 %v61_v20, %v60_v19  ;;  %v63_v23 = vld [vmem:[#allocation7 + $0x68] sm:$0xff]  ;;  %v64_v25 = vld [vmem:[#allocation7 + $0x70] sm:$0xff]  ;;  %v65_v26 = vld [vmem:[#allocation7 + $0x78] sm:$0xff]  ;;  %vm163_vm2 = vcmp.lt.s32.totalorder %v147_v41, 10  ;;  %v608_v12 = vmov 2102212464  }
  0x18   :  { %v529_v24 = vpack.c.bf16 %v63_v23, %v62_v22  ;;  %v532_v27 = vpack.c.bf16 %v65_v26, %v64_v25  ;;  %v151_v28 = vld [vmem:[%s719_s3] sm:$0xff]  ;;  %v610_v16 = vmov 2131351028  }
  0x19   :  { %153 = vperm.xlu1 %552, %v151_v28   ;;  %v447_v36 = vld [vmem:[%s717_s1] ss:$0 sm:$0xff] }
  0x1c   :  { %v156_v50 = vld [vmem:[#allocation6] sm:$0xff] }
  0x1d   :  { %v662_v47 = vld [vmem:[#allocation4] sm:$0xff] }
  0x1e   :  { %515 = vmatpush3.bf16.xpose.msra.mxu0 %v514_v8  ;;  %v607_v8 = vmov 1326507024  }
  0x1f   :  { %516 = vmatprep.subr.bf16.mxu0 %v601_v0 }
  0x26   :  { %518 = vmatpush3.bf16.xpose.msra.mxu0 %v517_v11 }
  0x27   :  { %519 = vmatprep.subr.bf16.mxu0 %v601_v0 }
  0x2e   :  { %521 = vmatpush3.bf16.xpose.msra.mxu0 %v520_v14  ;;  %v609_v14 = vmov 2475754826  }
  0x2f   :  { %522 = vmatprep.subr.bf16.mxu0 %v601_v0 }
  0x36   :  { %524 = vmatpush3.bf16.xpose.msra.mxu0 %v523_v17 }
  0x37   :  { %525 = vmatprep.subr.bf16.mxu0 %v601_v0 }
  0x3e   :  { %527 = vmatpush3.bf16.xpose.msra.mxu0 %v526_v21  ;;  %v611_v21 = vmov 683565275  }
  0x3f   :  { %528 = vmatprep.subr.bf16.mxu0 %v601_v0 }
  0x46   :  { %530 = vmatpush3.bf16.xpose.msra.mxu0 %v529_v24 }
  0x47   :  { %531 = vmatprep.subr.bf16.mxu0 %v601_v0 }
  0x4e   :  { %533 = vmatpush3.bf16.xpose.msra.mxu0 %v532_v27 }
  0x98   :  { %v154_v43 = vpop.permute.xlu1 %153 }
  0x99   :  { %vm155_vm3 = vcmp.eq.s32.totalorder %v147_v41, %v154_v43 }
  0xa2   :  { %v38_v30 = vpop.xlane.xlu0 %37 }
  0xa3   :  { %v39_v31 = vmax.f32 %v38_v30, 1e-24 }
  0xa5   :  { %554 = vrsqrt.f32 %v39_v31 }
  0xaf   :  { %v555_v32 = vpop.eup %554 }
  0xb0   :  { %v43_v33 = vmul.f32 %v555_v32, %v38_v30  ;;  %v41_v34 = vmul.f32 %v555_v32, %v35_v1 }
  0xb2   :  { %45 = vst.msk [vmem:[#allocation3] sm:$0xff] %vm44_vm0, %v43_v33  ;;  %508 = vmatmul.mubr.f32.vlgmr.msra.gmra.mrb[0].mxu0 %v41_v34 }
  0xb9   :  { %v191_v54 = vld [vmem:[#allocation3] sm:$0xff] }
  0xba   :  { %v192_v55 = vmax.f32 %v191_v54, 10.0 }
  0xbc   :  { %v673_v56 = vmin.f32 %v192_v55, 110.0 }
  0xbe   :  { %v449_v57 = vadd.f32 -10.0, %v673_v56 }
  0xc0   :  { %v195_v58 = vmul.f32 0.004, %v449_v57 }
  0xc2   :  { %v676_v59 = vadd.f32 0.4, %v195_v58 }
  0xc4   :  { %v211_v60 = vand.u32 2139095040, %v676_v59  ;;  %v208_v10 = vand.u32 2147483647, %v676_v59  ;;  %vm210_vm11 = vcmp.lt.s32.totalorder %v676_v59, 0 }
  0xc6   :  { %v212_v61 = vshrl.u32 %v211_v60, 23  ;;  %v215_v26 = vand.u32 8388607, %v208_v10  ;;  %vm209_vm12 = vcmp.le.f32.partialorder %v208_v10, 0.7853982 }
  0xc8   :  { %v450_v62 = vadd.s32 4294967169, %v212_v61  ;;  %v216_v32 = vor.u32 8388608, %v215_v26 }
  0xca   :  { %v218_v63 = vadd.s32 1, %v450_v62 }
  0xcc   :  { %vm219_vm4 = vcmp.gt.s32.totalorder %v218_v63, 0 }
  0xcd   :  { %v220_v0 = vsel %vm219_vm4, %v218_v63, 0 }
  0xce   :  { %v222_v1 = vand.u32 31, %v220_v0  ;;  %v221_v11 = vshrl.u32 %v220_v0, 5 }
  0xd0   :  { %v223_v2 = vsub.s32 32, %v222_v1  ;;  %v234_v13 = vshll.u32 %v608_v12, %v222_v1  ;;  %v237_v19 = vshll.u32 %v606_v5, %v222_v1  ;;  %v225_v22 = vshll.u32 %v611_v21, %v222_v1 }
  0xd1   :  { %v228_v23 = vshll.u32 %v609_v14, %v222_v1  ;;  %v231_v24 = vshll.u32 %v610_v16, %v222_v1  ;;  %vm243_vm5 = vcmp.lt.s32.totalorder %v221_v11, 4  ;;  %vm240_vm6 = vcmp.lt.s32.totalorder %v221_v11, 1 }
  0xd2   :  { %v235_v6 = vshrl.u32 %v606_v5, %v223_v2  ;;  %v238_v9 = vshrl.u32 %v607_v8, %v223_v2  ;;  %v226_v15 = vshrl.u32 %v609_v14, %v223_v2  ;;  %v229_v17 = vshrl.u32 %v610_v16, %v223_v2 }
  0xd3   :  { %v232_v18 = vshrl.u32 %v608_v12, %v223_v2  ;;  %vm242_vm7 = vcmp.lt.s32.totalorder %v221_v11, 3  ;;  %vm241_vm8 = vcmp.lt.s32.totalorder %v221_v11, 2 }
  0xd4   :  { %v236_v20 = vor.u32 %v235_v6, %v234_v13  ;;  %v239_v25 = vor.u32 %v238_v9, %v237_v19  ;;  %v227_v27 = vor.u32 %v226_v15, %v225_v22  ;;  %v230_v28 = vor.u32 %v229_v17, %v228_v23 }
  0xd5   :  { %v233_v29 = vor.u32 %v232_v18, %v231_v24 }
  0xd6   :  { %v249_v30 = vsel %vm243_vm5, %v236_v20, 920167782  ;;  %v253_v31 = vsel %vm243_vm5, %v239_v25, 1326507024  ;;  %v248_v33 = vsel %vm240_vm6, %v227_v27, %v230_v28 }
  0xd7   :  { %v250_v34 = vsel %vm242_vm7, %v233_v29, %v249_v30  ;;  %v254_v37 = vsel %vm242_vm7, %v236_v20, %v253_v31 }
 0x185   :  { %v132_v38 = vpop.f32.mrb[0].mxu0 }
 0x186   :  { %v143_v39 = vmul.f32 %v447_v36, %v132_v38  ;;  %v509_v40 = vpop.f32.mrb[1].mxu0  ;;  %v252_v36 = vsel %vm240_vm6, %v230_v28, %v233_v29  ;;  %v251_v38 = vsel %vm241_vm8, %v248_v33, %v250_v34 }
 0x187   :  { %v256_v40 = vshll.u32 %v216_v32, 8 }
 0x188   :  { %v448_v42 = vclamps-f32 %v143_v39, 1.0  ;;  %v255_v39 = vsel %vm241_vm8, %v252_v36, %v254_v37 }
 0x18a   :  { %v164_v44 = vmul.f32 80.0, %v448_v42  ;;  %v157_v46 = vsel %vm155_vm3, %v448_v42, 0.0  ;;  %v688_v41 = vmul.u32.u64.low %v256_v40, %v251_v38  ;;  %v689_v42 = vmul.u32.u64.high %v256_v40, %v251_v38, %v688_v41 }
 0x18c   :  { %v165_v45 = vsel %vm163_vm2, %v164_v44, -1e+30  ;;  %v691_v43 = vmul.u32.u64.low %v256_v40, %v255_v39  ;;  %v692_v44 = vmul.u32.u64.high %v256_v40, %v255_v39, %v691_v43 }
 0x18d   :  { %167 = vmax.xlane.f32.xlu0 %v165_v45 }
 0x18e   :  { %vm265_vm9 = vc.u32 %v692_v44, %v688_v41 }
 0x191   :  { %158 = vadd.xlane.f32.xlu0 %v157_v46  ;;  %v224_v46 = vshrl.u32 %v611_v21, %v223_v2 }
 0x21a   :  { %v168_v48 = vpop.xlane.xlu0 %167 }
 0x21b   :  { %v665_v49 = vmax.f32 %v662_v47, %v168_v48  ;;  %v244_v48 = vsel %vm240_vm6, %v224_v46, %v227_v27  ;;  %vm300_vm6 = vweird.f32 %v676_v59 }
 0x21d   :  { %v170_v51 = vsub.f32 %v662_v47, %v665_v49  ;;  %187 = vst.msk [vmem:[#allocation4] sm:$0xff] %vm44_vm0, %v665_v49  ;;  %177 = vperm.xlu1 %552, %v665_v49  }
 0x21e   :  { %v159_v52 = vpop.xlane.xlu0 %158 }
 0x21f   :  { %v160_v53 = vadd.f32 %v159_v52, %v156_v50  ;;  %v266_v52 = vadd.s32 1, %v689_v42 }
 0x221   :  { %162 = vst.msk [vmem:[#allocation6] sm:$0xff] %vm44_vm0, %v160_v53  ;;  %v267_v54 = vsel %vm265_vm9, %v266_v52, %v689_v42 }
 0x228   :  { %v197_v17 = vld [vmem:[#allocation6] sm:$0xff] }
 0x229   :  { %v198_v19 = vmul.f32 %v197_v17, %v197_v17 }
 0x22b   :  { %v199_v21 = vsub.f32 1.0, %v198_v19 }
 0x22d   :  { %v200_v23 = vmax.f32 %v199_v21, 0.0 }
 0x22f   :  { %vm203_vm15 = vcmp.eq.f32.partialorder %v200_v23, inf  ;;  %vm205_vm4 = vcmp.eq.f32.partialorder %v200_v23, 0.0 }
 0x29c   :  { %v178_v3 = vpop.permute.xlu1 %177 }
 0x29d   :  { %v180_v4 = vsub.f32 %v165_v45, %v178_v3  ;;  %v245_v45 = vsel %vm243_vm5, %v233_v29, 2102212464 }
 0x29e   :  { %v246_v50 = vsel %vm242_vm7, %v230_v28, %v245_v45  ;;  %vm418_vm7 = vcmp.gt.f32.partialorder %v197_v17, 0.0 }
 0x29f   :  { %v181_v7 = vmul.f32 1.442695, %v180_v4  ;;  %v247_v53 = vsel %vm241_vm8, %v244_v48, %v246_v50  ;;  %v171_v50 = vmul.f32 1.442695, %v170_v51 }
 0x2a0   :  { %v263_v55 = vmul.u32 %v256_v40, %v247_v53  ;;  %v206_v40 = vand.u32 2147483648, %v200_v23 }
 0x2a1   :  { %556 = vpow2.f32 %v181_v7  ;;  %v264_v7 = vadd.s32 %v688_v41, %v692_v44 }
 0x2a2   :  { %v268_v57 = vadd.s32 %v267_v54, %v263_v55  ;;  %v420_v54 = vmul.f32 80.0, %v197_v17 }
 0x2a4   :  { %v269_v58 = vadd.s32 536870912, %v268_v57 }
 0x2a6   :  { %v270_v60 = vshrl.u32 %v269_v58, 30 }
 0x2a8   :  { %v271_v61 = vshll.u32 %v270_v60, 30  ;;  %v294_v24 = vsub.s32 4, %v270_v60 }
 0x2aa   :  { %v272_v62 = vsub.s32 %v268_v57, %v271_v61  ;;  %v295_v25 = vsel %vm210_vm11, %v294_v24, %v270_v60  ;;  %v422_v57 = vld [vmem:[#allocation4] sm:$0xff] }
 0x2ab   :  { %v557_v35 = vpop.eup %556  ;;  %v297_v26 = vsel %vm209_vm12, 0, %v295_v25  ;;  %v424_v58 = vsub.f32 %v420_v54, %v422_v57 }
 0x2ac   :  { %183 = vadd.xlane.f32.xlu1 %v557_v35  ;;  %v274_v63 = vsub.s32 0, %v272_v62  ;;  %v405_v27 = vadd.s32 3, %v297_v26  ;;  %v301_v34 = vand.u32 3, %v297_v26 }
 0x2ae   :  { %v451_v0 = vmin.u32 %v274_v63, %v272_v62  ;;  %v406_v31 = vand.u32 3, %v405_v27  ;;  %vm303_vm1 = vcmp.eq.s32.totalorder %v301_v34, 0  ;;  %vm306_vm2 = vcmp.eq.s32.totalorder %v301_v34, 2 }
 0x2af   :  { %vm302_vm5 = vcmp.lt.s32.totalorder %v301_v34, 2 }
 0x2b0   :  { %v276_v1 = vclz %v451_v0  ;;  %vm408_vm13 = vcmp.eq.s32.totalorder %v406_v31, 0  ;;  %vm411_vm14 = vcmp.eq.s32.totalorder %v406_v31, 2  ;;  %vm407_vm3 = vcmp.lt.s32.totalorder %v406_v31, 2 }
 0x2b2   :  { %v452_v2 = vadd.s32 4294967294, %v276_v1 }
 0x2b4   :  { %vm453_vm10 = vcmp.lt.s32.totalorder %v452_v2, 0 }
 0x2b5   :  { %v279_v3 = vsel %vm453_vm10, 0, %v452_v2 }
 0x2b6   :  { %v284_v4 = vsub.s32 4294967266, %v279_v3  ;;  %v280_v6 = vsub.s32 32, %v279_v3  ;;  %v281_v11 = vshll.u32 %v272_v62, %v279_v3  ;;  %v173_v62 = vld [vmem:[#allocation5] sm:$0xff] }
 0x2b8   :  { %v285_v5 = vadd.s32 127, %v284_v4  ;;  %v282_v9 = vshrl.u32 %v264_v7, %v280_v6  ;;  %v437_v6 = vmul.f32 8.264463e-05, %v673_v56 }
 0x2ba   :  { %v286_v8 = vshll.u32 %v285_v5, 23  ;;  %v283_v13 = vor.u32 %v282_v9, %v281_v11 }
 0x2bc   :  { %v287_v12 = vor.u32 4788187, %v286_v8  ;;  %v290_v15 = vcvt.s32.f32 %v283_v13 }
 0x2be   :  { %v288_v14 = vand.u32 2147483647, %v287_v12 }
 0x2c0   :  { %v291_v16 = vmul.f32 %v290_v15, %v288_v14 }
 0x2c2   :  { %v292_v18 = vxor.u32 2147483648, %v291_v16 }
 0x2c4   :  { %v293_v20 = vsel %vm210_vm11, %v292_v18, %v291_v16 }
 0x2c5   :  { %v296_v22 = vsel %vm209_vm12, %v676_v59, %v293_v20  ;;  %v425_v59 = vmul.f32 1.442695, %v424_v58 }
 0x2c6   :  { %558 = vcosq.f32 %v296_v22 }
 0x2c7   :  { %560 = vsinq.f32 %v296_v22 }
 0x2c8   :  { %562 = vrsqrt.f32 %v200_v23 }
 0x2c9   :  { %564 = vpow2.f32 %v171_v50 }
 0x2ca   :  { %566 = vpow2.f32 %v425_v59 }
 0x2d0   :  { %v559_v28 = vpop.eup %558 }
 0x2d1   :  { %v561_v29 = vpop.eup %560  ;;  %v307_v33 = vxor.u32 2147483648, %v559_v28 }
 0x2d2   :  { %v563_v30 = vpop.eup %562  ;;  %v304_v32 = vxor.u32 2147483648, %v561_v29 }
 0x2d3   :  { %v202_v35 = vmul.f32 %v563_v30, %v200_v23  ;;  %v413_v36 = vsel %vm411_vm14, %v307_v33, %v561_v29  ;;  %v308_v39 = vsel %vm306_vm2, %v307_v33, %v561_v29  ;;  %v565_v61 = vpop.eup %564 }
 0x2d4   :  { %v410_v10 = vsel %vm408_vm13, %v559_v28, %v304_v32  ;;  %v305_v38 = vsel %vm303_vm1, %v559_v28, %v304_v32  ;;  %v174_v0 = vmul.f32 %v565_v61, %v173_v62  ;;  %v567_v47 = vpop.eup %566 }
 0x2d5   :  { %v204_v37 = vsel %vm203_vm15, %v200_v23, %v202_v35  ;;  %v414_v41 = vsel %vm407_vm3, %v410_v10, %v413_v36  ;;  %v309_v43 = vsel %vm302_vm5, %v305_v38, %v308_v39 }
 0x2d6   :  { %v207_v42 = vsel %vm205_vm4, %v206_v40, %v204_v37  ;;  %v415_v44 = vsel %vm300_vm6, nan, %v414_v41  ;;  %v310_v46 = vsel %vm300_vm6, nan, %v309_v43 }
 0x2d7   :  { %v416_v45 = vmul.f32 %v415_v44, %v207_v42  ;;  %v311_v48 = vmul.f32 %v310_v46, %v197_v17 }
 0x2d9   :  { %v417_v52 = vsub.f32 %v311_v48, %v416_v45 }
 0x2db   :  { %v419_v53 = vsel %vm418_vm7, %v417_v52, %v197_v17 }
 0x2dc   :  { %v421_v55 = vmul.f32 80.0, %v419_v53 }
 0x2de   :  { %v428_v60 = vsub.f32 %v421_v55, %v422_v57 }
 0x2e0   :  { %v429_v63 = vmul.f32 1.442695, %v428_v60 }
 0x2e2   :  { %568 = vpow2.f32 %v429_v63 }
 0x2e3   :  { %570 = vrcp.f32 %v673_v56 }
 0x2ec   :  { %v569_v3 = vpop.eup %568 }
 0x2ed   :  { %v571_v5 = vpop.eup %570 }
 0x2ee   :  { %v438_v8 = vadd.f32 %v571_v5, %v437_v6 }
 0x2f0   :  { %v439_v12 = vmul.f32 32.266666, %v438_v8 }
 0x339   :  { %v184_v1 = vpop.xlane.xlu1 %183 }
 0x33a   :  { %v185_v2 = vadd.f32 %v184_v1, %v174_v0 }
 0x33c   :  { %186 = vst.msk [vmem:[#allocation5] sm:$0xff] %vm44_vm0, %v185_v2 }
 0x343   :  { %v423_v49 = vld [vmem:[#allocation5] sm:$0xff] }
 0x344   :  { %v427_v51 = vsub.f32 %v423_v49, %v567_v47 }
 0x346   :  { %v431_v4 = vadd.f32 %v569_v3, %v427_v51 }
 0x348   :  { %572 = vlog2.f32 %v431_v4 }
 0x352   :  { %v573_v7 = vpop.eup %572 }
 0x353   :  { %v433_v9 = vmul.f32 0.6931472, %v573_v7 }
 0x355   :  { %v434_v11 = vadd.f32 %v433_v9, %v422_v57 }
 0x357   :  { %v435_v13 = vsub.f32 %v434_v11, %v421_v55 }
 0x359   :  { %v440_v14 = vadd.f32 %v439_v12, %v435_v13 }
 0x35b   :  { %441 = vst.msk [vmem:[%s720_s4] sm:$0xff] %vm44_vm0, %v440_v14 }
 0x35c   :  { %446 = vsyncpa [#allocation8], 1 }

</bundles_post_ra>
